<compile_context>
chip_gen: v7x
topology: tpu7x:2x2x1
jax: 0.10.0
libtpu: 0.0.40
codegen_flags: <defaults>
</compile_context>

<pallas_src>
import functools

import jax
import jax.numpy as jnp
from jax.experimental import pallas as pl
from jax.experimental.pallas import tpu as pltpu

LANE = 128
SUBLANE = 8
SMALL_BATCH_FAST_PATH = 256   # below this, fused XLA dots beat Pallas fixed overhead
MAX_BATCH_TILE = 4096         # ~3 MB/step of VMEM at Hp=128 — far under every gen's limit


# ----------------------------- kernel ------------------------------------- #

def mlp_kernel(x_ref, w1_ref, b1_ref, w2_ref, b2_ref,
               w3_ref, b3_ref, w4_ref, b4_ref, o_ref):
    # x arrives f32; cast to the matmul dtype on the VPU (hidden under DMA/MXU).
    # Matmuls accumulate in f32 on the MXU; bias add / ReLU stay f32 on the VPU.
    x = x_ref[...].astype(w1_ref.dtype)

    h = jnp.dot(x, w1_ref[...], preferred_element_type=jnp.float32) + b1_ref[...]
    h = jnp.maximum(h, 0.0)

    h = jnp.dot(h.astype(w2_ref.dtype), w2_ref[...],
                preferred_element_type=jnp.float32) + b2_ref[...]
    h = jnp.maximum(h, 0.0)

    h = jnp.dot(h.astype(w3_ref.dtype), w3_ref[...],
                preferred_element_type=jnp.float32) + b3_ref[...]
    h = jnp.maximum(h, 0.0)

    out = jnp.dot(h.astype(w4_ref.dtype), w4_ref[...],
                  preferred_element_type=jnp.float32) + b4_ref[...]
    o_ref[...] = out.astype(o_ref.dtype)


# ----------------------------- wrapper ------------------------------------ #

def _round_up(n, m):
    return ((n + m - 1) // m) * m


def _pad2d(a, rows, cols):
    r, c = a.shape
    return jnp.pad(a, ((0, rows - r), (0, cols - c)))


def prepare_params(params, matmul_dtype=jnp.bfloat16):
    """One-time weight prep: pad feature dims to lane width (128) and cast
    MXU operands. Do this at init, NOT per forward call.

    Zero weight rows/cols and zero bias pads keep the math exact; padded
    output columns are identically 0 and are sliced off in the forward.
    Returns (prepared_pytree, logical_out_dim)."""
    in_dim, hidden = params["w1"].shape
    out_dim = params["w4"].shape[1]
    Hp = _round_up(hidden, LANE)   # lane-dense hidden width (keep at 128 min —
    Op = _round_up(out_dim, LANE)  # padding beyond 128 adds bytes, saves nothing)
    prepared = {
        "w1": _pad2d(params["w1"], in_dim, Hp).astype(matmul_dtype),
        "w2": _pad2d(params["w2"], Hp, Hp).astype(matmul_dtype),
        "w3": _pad2d(params["w3"], Hp, Hp).astype(matmul_dtype),
        "w4": _pad2d(params["w4"], Hp, Op).astype(matmul_dtype),
        "b1": _pad2d(params["b1"], 1, Hp).astype(jnp.float32),
        "b2": _pad2d(params["b2"], 1, Hp).astype(jnp.float32),
        "b3": _pad2d(params["b3"], 1, Hp).astype(jnp.float32),
        "b4": _pad2d(params["b4"], 1, Op).astype(jnp.float32),
    }
    return prepared, out_dim


def _pick_batch_tile(B):
    """Sublane-aligned batch tile with >=2 grid steps whenever B >= 16
    (keeps both v7x TensorCores busy), capped at MAX_BATCH_TILE rows."""
    if B < 2 * SUBLANE:
        return SUBLANE                                   # single tiny tile (batch padded)
    return min(_round_up((B + 1) // 2, SUBLANE), MAX_BATCH_TILE)


@functools.partial(
    jax.jit,
    static_argnames=("out_dim", "batch_tile", "out_dtype", "force_pallas"))
def main_body_forward(x, prepared, *, out_dim, batch_tile=None,
                      out_dtype=jnp.float32, force_pallas=False):
    """Fused MLP forward on TPU.

    x:         (B, input_size) float32
    prepared:  pytree from prepare_params() (padded, MXU-dtype weights)
    out_dtype: output dtype; bf16 halves the dominant writeback stream at large B.
    """
    w1, b1 = prepared["w1"], prepared["b1"]
    w2, b2 = prepared["w2"], prepared["b2"]
    w3, b3 = prepared["w3"], prepared["b3"]
    w4, b4 = prepared["w4"], prepared["b4"]

    B, in_dim = x.shape
    Op = w4.shape[1]

    if B <= SMALL_BATCH_FAST_PATH and not force_pallas:
        # Small-batch fast path: at B=8 a Pallas call is pure fixed overhead;
        # let XLA fuse the dot chain (same math, same padded weights).
        h = jnp.maximum(jnp.dot(x.astype(w1.dtype), w1,
                                preferred_element_type=jnp.float32) + b1, 0.0)
        h = jnp.maximum(jnp.dot(h.astype(w2.dtype), w2,
                                preferred_element_type=jnp.float32) + b2, 0.0)
        h = jnp.maximum(jnp.dot(h.astype(w3.dtype), w3,
                                preferred_element_type=jnp.float32) + b3, 0.0)
        out = jnp.dot(h.astype(w4.dtype), w4,
                      preferred_element_type=jnp.float32) + b4
        return out[:, :out_dim].astype(out_dtype)

    tb = batch_tile or _pick_batch_tile(B)
    tb = max(SUBLANE, _round_up(tb, SUBLANE))
    Bp = _round_up(B, tb)                       # auto-pad batch (fused inside jit)
    xp = jnp.pad(x, ((0, Bp - B), (0, 0))) if Bp != B else x

    full = lambda a: pl.BlockSpec(a.shape, lambda i: (0, 0))

    out_padded = pl.pallas_call(
        mlp_kernel,
        out_shape=jax.ShapeDtypeStruct((Bp, Op), out_dtype),
        grid=(Bp // tb,),
        in_specs=[
            pl.BlockSpec((tb, in_dim), lambda i: (i, 0)),   # x (batch-tiled)
            full(w1), full(b1),
            full(w2), full(b2),
            full(w3), full(b3),
            full(w4), full(b4),
        ],
        out_specs=pl.BlockSpec((tb, Op), lambda i: (i, 0)),
        compiler_params=pltpu.CompilerParams(
            dimension_semantics=("parallel",)),
    )(xp, w1, b1, w2, b2, w3, b3, w4, b4)

    # Slice stays under jit so XLA fuses it — no standalone eager HBM pass.
    return out_padded[:B, :out_dim]


# --------------------------- init / reference ------------------------------ #

def init_params(key, input_size, hidden_size, output_size):
    """Deterministic PyTorch-Linear-style init (uniform +/- 1/sqrt(fan_in))."""
    dims = [(input_size, hidden_size),
            (hidden_size, hidden_size),
            (hidden_size, hidden_size),
            (hidden_size, output_size)]
    params = {}
    for idx, (fan_in, fan_out) in enumerate(dims, start=1):
        key, kw, kb = jax.random.split(key, 3)
        bound = 1.0 / jnp.sqrt(jnp.float32(fan_in))
        params[f"w{idx}"] = jax.random.uniform(
            kw, (fan_in, fan_out), jnp.float32, -bound, bound)
        params[f"b{idx}"] = jax.random.uniform(
            kb, (1, fan_out), jnp.float32, -bound, bound)
    return params


def reference_forward(x, params):
    h = jnp.maximum(x @ params["w1"] + params["b1"], 0.0)
    h = jnp.maximum(h @ params["w2"] + params["b2"], 0.0)
    h = jnp.maximum(h @ params["w3"] + params["b3"], 0.0)
    return h @ params["w4"] + params["b4"]


# -------------------------------- main ------------------------------------- #

if __name__ == "__main__":
    input_size, hidden_size, output_size = 16, 32, 4
    batch = 8

    key = jax.random.PRNGKey(0)
    key, kx, kxb = jax.random.split(key, 3)
    x = jax.random.normal(kx, (batch, input_size), jnp.float32)
    params = init_params(key, input_size, hidden_size, output_size)
    ref = reference_forward(x, params)

    # One-time padded/cast parameter pytrees (hoisted out of the per-call path).
    prep_f32, out_dim = prepare_params(params, matmul_dtype=jnp.float32)
    prep_bf16, _ = prepare_params(params)          # default: bf16 MXU operands

    # Small batch, Pallas path forced, f32 operands — bit-faithful check.
    out = jax.block_until_ready(
        main_body_forward(x, prep_f32, out_dim=out_dim, force_pallas=True))
    assert out.shape == (batch, output_size)
    assert jnp.allclose(out, ref, atol=1e-5, rtol=1e-5), "f32 Pallas mismatch"

    # Small batch, default routing (fused XLA fast path), bf16 operands.
    out_fast = jax.block_until_ready(
        main_body_forward(x, prep_bf16, out_dim=out_dim))
    assert out_fast.shape == (batch, output_size)
    assert jnp.allclose(out_fast, ref, atol=5e-2, rtol=5e-2), "bf16 fast-path mismatch"

    # Small batch, Pallas path forced, bf16 operands (deployment shape on-kernel).
    out_small_bf16 = jax.block_until_ready(
        main_body_forward(x, prep_bf16, out_dim=out_dim, force_pallas=True))
    assert jnp.allclose(out_small_bf16, ref, atol=5e-2, rtol=5e-2), "bf16 Pallas mismatch"

    # Large, non-multiple-of-8 batch: auto-padded, >=2 parallel grid steps.
    x_big = jax.random.normal(kxb, (1000, input_size), jnp.float32)
    ref_big = reference_forward(x_big, params)

    out_big_f32 = jax.block_until_ready(
        main_body_forward(x_big, prep_f32, out_dim=out_dim))
    assert out_big_f32.shape == (1000, output_size)
    assert jnp.allclose(out_big_f32, ref_big, atol=1e-4, rtol=1e-4), "tiled f32 mismatch"

    out_big_bf16 = jax.block_until_ready(
        main_body_forward(x_big, prep_bf16, out_dim=out_dim))
    assert jnp.allclose(out_big_bf16, ref_big, atol=1e-1, rtol=5e-2), "tiled bf16 mismatch"

    # Optional bf16 output (halves the dominant writeback stream).
    out_big_bf16out = jax.block_until_ready(
        main_body_forward(x_big, prep_bf16, out_dim=out_dim, out_dtype=jnp.bfloat16))
    assert out_big_bf16out.dtype == jnp.bfloat16
    assert jnp.allclose(out_big_bf16out.astype(jnp.float32), ref_big,
                        atol=1e-1, rtol=5e-2), "bf16-output mismatch"

    print("KERNEL_OK")
</pallas_src>

<mosaic_0001>
module attributes {stable_mosaic.version = 11 : i64} {
  func.func @mlp_kernel(%arg0: i32, %arg1: memref<8x16xf32, #tpu.memory_space<vmem>>, %arg2: memref<16x128xf32, #tpu.memory_space<vmem>>, %arg3: memref<1x128xf32, #tpu.memory_space<vmem>>, %arg4: memref<128x128xf32, #tpu.memory_space<vmem>>, %arg5: memref<1x128xf32, #tpu.memory_space<vmem>>, %arg6: memref<128x128xf32, #tpu.memory_space<vmem>>, %arg7: memref<1x128xf32, #tpu.memory_space<vmem>>, %arg8: memref<128x128xf32, #tpu.memory_space<vmem>>, %arg9: memref<1x128xf32, #tpu.memory_space<vmem>>, %arg10: memref<8x128xf32, #tpu.memory_space<vmem>>) attributes {dimension_semantics = [#tpu.dimension_semantics<parallel>], iteration_bounds = array<i64: 1>, scalar_prefetch = 0 : i64, scratch_operands = 0 : i64, tpu.core_type = #tpu.core_type<tc>, window_params = [{transform_indices = @transform_0, window_bounds = array<i64: 8, 16>}, {pipeline_mode = #tpu.pipeline_mode<synchronous>, transform_indices = @transform_1, window_bounds = array<i64: 16, 128>}, {pipeline_mode = #tpu.pipeline_mode<synchronous>, transform_indices = @transform_2, window_bounds = array<i64: 1, 128>}, {pipeline_mode = #tpu.pipeline_mode<synchronous>, transform_indices = @transform_3, window_bounds = array<i64: 128, 128>}, {pipeline_mode = #tpu.pipeline_mode<synchronous>, transform_indices = @transform_4, window_bounds = array<i64: 1, 128>}, {pipeline_mode = #tpu.pipeline_mode<synchronous>, transform_indices = @transform_5, window_bounds = array<i64: 128, 128>}, {pipeline_mode = #tpu.pipeline_mode<synchronous>, transform_indices = @transform_6, window_bounds = array<i64: 1, 128>}, {pipeline_mode = #tpu.pipeline_mode<synchronous>, transform_indices = @transform_7, window_bounds = array<i64: 128, 128>}, {pipeline_mode = #tpu.pipeline_mode<synchronous>, transform_indices = @transform_8, window_bounds = array<i64: 1, 128>}, {transform_indices = @transform_9, window_bounds = array<i64: 8, 128>}]} {
    %c0 = arith.constant 0 : index
    %c0_0 = arith.constant 0 : index
    %0 = vector.load %arg1[%c0, %c0_0] : memref<8x16xf32, #tpu.memory_space<vmem>>, vector<8x16xf32>
    %c0_1 = arith.constant 0 : index
    %c0_2 = arith.constant 0 : index
    %1 = vector.load %arg2[%c0_1, %c0_2] : memref<16x128xf32, #tpu.memory_space<vmem>>, vector<16x128xf32>
    %cst = arith.constant dense<0.000000e+00> : vector<8x128xf32>
    %2 = tpu.matmul %0, %1, %cst {dimension_numbers = #tpu.dot_dimension_numbers<[1], [0], [0], [1], [0, 0, 1, 1], [], []>} : vector<8x16xf32>, vector<16x128xf32>, vector<8x128xf32> -> vector<8x128xf32>
    %c0_3 = arith.constant 0 : index
    %c0_4 = arith.constant 0 : index
    %3 = vector.load %arg3[%c0_3, %c0_4] : memref<1x128xf32, #tpu.memory_space<vmem>>, vector<1x128xf32>
    %4 = vector.broadcast %3 : vector<1x128xf32> to vector<8x128xf32>
    %5 = arith.addf %2, %4 : vector<8x128xf32>
    %cst_5 = arith.constant 0.000000e+00 : f32
    %6 = vector.broadcast %cst_5 : f32 to vector<8x128xf32>
    %7 = arith.maximumf %5, %6 : vector<8x128xf32>
    %c0_6 = arith.constant 0 : index
    %c0_7 = arith.constant 0 : index
    %8 = vector.load %arg4[%c0_6, %c0_7] : memref<128x128xf32, #tpu.memory_space<vmem>>, vector<128x128xf32>
    %cst_8 = arith.constant dense<0.000000e+00> : vector<8x128xf32>
    %9 = tpu.matmul %7, %8, %cst_8 {dimension_numbers = #tpu.dot_dimension_numbers<[1], [0], [0], [1], [0, 0, 1, 1], [], []>} : vector<8x128xf32>, vector<128x128xf32>, vector<8x128xf32> -> vector<8x128xf32>
    %c0_9 = arith.constant 0 : index
    %c0_10 = arith.constant 0 : index
    %10 = vector.load %arg5[%c0_9, %c0_10] : memref<1x128xf32, #tpu.memory_space<vmem>>, vector<1x128xf32>
    %11 = vector.broadcast %10 : vector<1x128xf32> to vector<8x128xf32>
    %12 = arith.addf %9, %11 : vector<8x128xf32>
    %cst_11 = arith.constant 0.000000e+00 : f32
    %13 = vector.broadcast %cst_11 : f32 to vector<8x128xf32>
    %14 = arith.maximumf %12, %13 : vector<8x128xf32>
    %c0_12 = arith.constant 0 : index
    %c0_13 = arith.constant 0 : index
    %15 = vector.load %arg6[%c0_12, %c0_13] : memref<128x128xf32, #tpu.memory_space<vmem>>, vector<128x128xf32>
    %cst_14 = arith.constant dense<0.000000e+00> : vector<8x128xf32>
    %16 = tpu.matmul %14, %15, %cst_14 {dimension_numbers = #tpu.dot_dimension_numbers<[1], [0], [0], [1], [0, 0, 1, 1], [], []>} : vector<8x128xf32>, vector<128x128xf32>, vector<8x128xf32> -> vector<8x128xf32>
    %c0_15 = arith.constant 0 : index
    %c0_16 = arith.constant 0 : index
    %17 = vector.load %arg7[%c0_15, %c0_16] : memref<1x128xf32, #tpu.memory_space<vmem>>, vector<1x128xf32>
    %18 = vector.broadcast %17 : vector<1x128xf32> to vector<8x128xf32>
    %19 = arith.addf %16, %18 : vector<8x128xf32>
    %cst_17 = arith.constant 0.000000e+00 : f32
    %20 = vector.broadcast %cst_17 : f32 to vector<8x128xf32>
    %21 = arith.maximumf %19, %20 : vector<8x128xf32>
    %c0_18 = arith.constant 0 : index
    %c0_19 = arith.constant 0 : index
    %22 = vector.load %arg8[%c0_18, %c0_19] : memref<128x128xf32, #tpu.memory_space<vmem>>, vector<128x128xf32>
    %cst_20 = arith.constant dense<0.000000e+00> : vector<8x128xf32>
    %23 = tpu.matmul %21, %22, %cst_20 {dimension_numbers = #tpu.dot_dimension_numbers<[1], [0], [0], [1], [0, 0, 1, 1], [], []>} : vector<8x128xf32>, vector<128x128xf32>, vector<8x128xf32> -> vector<8x128xf32>
    %c0_21 = arith.constant 0 : index
    %c0_22 = arith.constant 0 : index
    %24 = vector.load %arg9[%c0_21, %c0_22] : memref<1x128xf32, #tpu.memory_space<vmem>>, vector<1x128xf32>
    %25 = vector.broadcast %24 : vector<1x128xf32> to vector<8x128xf32>
    %26 = arith.addf %23, %25 : vector<8x128xf32>
    %c0_23 = arith.constant 0 : index
    %c0_24 = arith.constant 0 : index
    %27 = vector.load %arg10[%c0_23, %c0_24] : memref<8x128xf32, #tpu.memory_space<vmem>>, vector<8x128xf32>
    tpu.vector_store %arg10[%c0_23, %c0_24], %26 {strides = array<i32>} : memref<8x128xf32, #tpu.memory_space<vmem>>, vector<8x128xf32>,
    return
  }
  func.func @transform_0(%arg0: i32) -> (i32, i32) {
    %c0_i32 = arith.constant 0 : i32
    %c0_i32_0 = arith.constant 0 : i32
    return %arg0, %c0_i32 : i32, i32
  }
  func.func @transform_1(%arg0: i32) -> (i32, i32) {
    %c0_i32 = arith.constant 0 : i32
    %c0_i32_0 = arith.constant 0 : i32
    %c0_i32_1 = arith.constant 0 : i32
    return %c0_i32, %c0_i32_0 : i32, i32
  }
  func.func @transform_2(%arg0: i32) -> (i32, i32) {
    %c0_i32 = arith.constant 0 : i32
    %c0_i32_0 = arith.constant 0 : i32
    %c0_i32_1 = arith.constant 0 : i32
    return %c0_i32, %c0_i32_0 : i32, i32
  }
  func.func @transform_3(%arg0: i32) -> (i32, i32) {
    %c0_i32 = arith.constant 0 : i32
    %c0_i32_0 = arith.constant 0 : i32
    %c0_i32_1 = arith.constant 0 : i32
    return %c0_i32, %c0_i32_0 : i32, i32
  }
  func.func @transform_4(%arg0: i32) -> (i32, i32) {
    %c0_i32 = arith.constant 0 : i32
    %c0_i32_0 = arith.constant 0 : i32
    %c0_i32_1 = arith.constant 0 : i32
    return %c0_i32, %c0_i32_0 : i32, i32
  }
  func.func @transform_5(%arg0: i32) -> (i32, i32) {
    %c0_i32 = arith.constant 0 : i32
    %c0_i32_0 = arith.constant 0 : i32
    %c0_i32_1 = arith.constant 0 : i32
    return %c0_i32, %c0_i32_0 : i32, i32
  }
  func.func @transform_6(%arg0: i32) -> (i32, i32) {
    %c0_i32 = arith.constant 0 : i32
    %c0_i32_0 = arith.constant 0 : i32
    %c0_i32_1 = arith.constant 0 : i32
    return %c0_i32, %c0_i32_0 : i32, i32
  }
  func.func @transform_7(%arg0: i32) -> (i32, i32) {
    %c0_i32 = arith.constant 0 : i32
    %c0_i32_0 = arith.constant 0 : i32
    %c0_i32_1 = arith.constant 0 : i32
    return %c0_i32, %c0_i32_0 : i32, i32
  }
  func.func @transform_8(%arg0: i32) -> (i32, i32) {
    %c0_i32 = arith.constant 0 : i32
    %c0_i32_0 = arith.constant 0 : i32
    %c0_i32_1 = arith.constant 0 : i32
    return %c0_i32, %c0_i32_0 : i32, i32
  }
  func.func @transform_9(%arg0: i32) -> (i32, i32) {
    %c0_i32 = arith.constant 0 : i32
    %c0_i32_0 = arith.constant 0 : i32
    return %arg0, %c0_i32 : i32, i32
  }
}

</mosaic_0001>

<bundles_post_ra>
// kernel: main_body_forward.1
= control target key start
LH: loop header
LB: loop body
LE: loop exit
PB: predicated region body
PF: predicated region fallthrough
CT: control target
= control target key end

     0   :  { %14 = vsyncpa [#allocation3], 0  ;;  %s1070_s0 = inlined_call_operand.hbm [shape: f32[8,16], index: 0, kind: input, shape index: {}]   ;;  %s1071_s1 = inlined_call_operand.vmem [shape: f32[16,128], index: 1, kind: input, shape index: {}]   ;;  %s1072_s2 = inlined_call_operand.vmem [shape: f32[1,128], index: 2, kind: input, shape index: {}]   ;;  %s1073_s3 = inlined_call_operand.hbm [shape: f32[128,128], index: 3, kind: input, shape index: {}]   ;;  %s1074_s4 = inlined_call_operand.vmem [shape: f32[1,128], index: 4, kind: input, shape index: {}]   ;;  %s1075_s5 = inlined_call_operand.hbm [shape: f32[128,128], index: 5, kind: input, shape index: {}]   ;;  %s1076_s6 = inlined_call_operand.hbm [shape: f32[1,128], index: 6, kind: input, shape index: {}]   ;;  %s1077_s7 = inlined_call_operand.hbm [shape: f32[128,128], index: 7, kind: input, shape index: {}]   ;;  %s1078_s8 = inlined_call_operand.hbm [shape: f32[1,128], index: 8, kind: input, shape index: {}]   ;;  %s1079_s9 = inlined_call_operand.vmem [shape: f32[8,128], index: 9, kind: output, shape index: {}]  }
   0x1   :  { %15 = vsyncpa [#allocation5], 0 }
   0x2   :  { %16 = vsyncpa [#allocation8], 0 }
   0x3   :  { %17 = vsyncpa [#allocation11], 0  ;;  %s880_s30 = smov [#allocation4]   ;;  %s740_s13 = scalar_lea.hbm %s1073_s3, 2048 }
   0x4   :  { %s37_s10 = sshll.u32 %s880_s30, 4  ;;  %p741_p0 = scmp.ne.s32.totalorder %s1073_s3, %s740_s13  ;;  %s38_s10 = int_to_ptr.vmem [resolvable:$true] %s37_s10 }
   0x5   :  { %p744_p1 = scmp.lt.u32.totalorder %s740_s13, %s1073_s3 }
   0x7   :  { %p746_p2 = pnand %p744_p1, %p741_p0 }
   0x9   :  { %749 = shalt.err (!%p746_p2)
}
   0xa   :  { %s750_s18 = scalar_lea.vmem %s38_s10, 2048  ;;  %p755_p4 = scmp.lt.s32.totalorder %s38_s10, %s38_s10 }
   0xb   :  { %p751_p3 = scmp.ne.s32.totalorder %s38_s10, %s750_s18  ;;  %p756_p5 = scmp.lt.s32.totalorder %s750_s18, %s750_s18 }
   0xd   :  { %p757_p6 = por %p756_p5, %p755_p4 }
   0xf   :  { %p758_p7 = pnand %p757_p6, %p751_p3 }
  0x11   :  { %761 = shalt.err (!%p758_p7)
}
  0x12   :  { %s881_s19 = smov 128   ;;  %s882_s20 = smov 8  }
  0x13   :  { %43 = dma.hbm_to_vmem [thread:$0]  %s1073_s3, 2048, %s38_s10, [#allocation5], %s881_s19, %s881_s19, %s882_s20  }
  0x14   :  { %s883_s23 = smov [#allocation7]   ;;  %s884_s25 = smov [#allocation2]  }
  0x15   :  { %s64_s24 = sshll.u32 %s883_s23, 4  ;;  %s24_s26 = sshll.u32 %s884_s25, 4  ;;  %s65_s24 = int_to_ptr.vmem [resolvable:$true] %s64_s24  ;;  %s25_s26 = int_to_ptr.vmem [resolvable:$true] %s24_s26 }
  0x16   :  { %s762_s29 = scalar_lea.hbm %s1076_s6, 16 }
  0x17   :  { %p763_p8 = scmp.ne.s32.totalorder %s1076_s6, %s762_s29  ;;  %p766_p9 = scmp.lt.u32.totalorder %s762_s29, %s1076_s6 }
  0x19   :  { %p768_p10 = pnand %p766_p9, %p763_p8 }
  0x1b   :  { %771 = shalt.err (!%p768_p10)
}
  0x1c   :  { %s772_s3 = scalar_lea.vmem %s65_s24, 16  ;;  %s776_s10 = scalar_lea.vmem %s65_s24, 32 }
  0x1d   :  { %p773_p11 = scmp.ne.s32.totalorder %s65_s24, %s772_s3  ;;  %p777_p12 = scmp.lt.s32.totalorder %s65_s24, %s65_s24 }
  0x1e   :  { %p778_p13 = scmp.lt.s32.totalorder %s776_s10, %s772_s3 }
  0x20   :  { %p779_p0 = por %p778_p13, %p777_p12 }
  0x22   :  { %p780_p1 = pnand %p779_p0, %p773_p11 }
  0x24   :  { %783 = shalt.err (!%p780_p1)
}
  0x25   :  { %67 = dma.hbm_to_vmem [thread:$0]  %s1076_s6, 16, %s65_s24, [#allocation8]  }
  0x26   :  { %s784_s18 = scalar_lea.hbm %s1070_s0, 128 }
  0x27   :  { %p785_p2 = scmp.ne.s32.totalorder %s1070_s0, %s784_s18  ;;  %p788_p3 = scmp.lt.u32.totalorder %s784_s18, %s1070_s0 }
  0x29   :  { %p790_p4 = pnand %p788_p3, %p785_p2 }
  0x2b   :  { %793 = shalt.err (!%p790_p4)
}
  0x2c   :  { %s794_s27 = scalar_lea.vmem %s25_s26, 128  ;;  %p799_p6 = scmp.lt.s32.totalorder %s25_s26, %s25_s26 }
  0x2d   :  { %p795_p5 = scmp.ne.s32.totalorder %s25_s26, %s794_s27  ;;  %p800_p7 = scmp.lt.s32.totalorder %s794_s27, %s794_s27 }
  0x2f   :  { %p801_p8 = por %p800_p7, %p799_p6 }
  0x31   :  { %p802_p9 = pnand %p801_p8, %p795_p5 }
  0x33   :  { %805 = shalt.err (!%p802_p9)
}
  0x34   :  { %27 = dma.hbm_to_vmem [thread:$0]  %s1070_s0, 128, %s25_s26, [#allocation3]  }
  0x35   :  { %s885_s28 = smov [#allocation6]   ;;  %s886_s30 = smov [#allocation9]  }
  0x36   :  { %s51_s29 = sshll.u32 %s885_s28, 4  ;;  %s73_s11 = sshll.u32 %s886_s30, 4  ;;  %s52_s29 = int_to_ptr.vmem [resolvable:$true] %s51_s29  ;;  %s74_s11 = int_to_ptr.vmem [resolvable:$true] %s73_s11 }
  0x37   :  { %s806_s3 = scalar_lea.hbm %s1075_s5, 2048 }
  0x38   :  { %p807_p10 = scmp.ne.s32.totalorder %s1075_s5, %s806_s3  ;;  %p810_p11 = scmp.lt.u32.totalorder %s806_s3, %s1075_s5 }
  0x3a   :  { %p812_p12 = pnand %p810_p11, %p807_p10 }
  0x3c   :  { %815 = shalt.err (!%p812_p12)
}
  0x3d   :  { %s816_s0 = scalar_lea.vmem %s52_s29, 2048  ;;  %p821_p0 = scmp.lt.s32.totalorder %s52_s29, %s52_s29 }
  0x3e   :  { %p817_p13 = scmp.ne.s32.totalorder %s52_s29, %s816_s0  ;;  %p822_p1 = scmp.lt.s32.totalorder %s816_s0, %s816_s0 }
  0x40   :  { %p823_p2 = por %p822_p1, %p821_p0 }
  0x42   :  { %p824_p3 = pnand %p823_p2, %p817_p13 }
  0x44   :  { %827 = shalt.err (!%p824_p3)
}
  0x45   :  { %57 = dma.hbm_to_vmem [thread:$0]  %s1075_s5, 2048, %s52_s29, [#allocation5], %s881_s19, %s881_s19, %s882_s20  }
  0x46   :  { %s828_s22 = scalar_lea.hbm %s1077_s7, 2048 }
  0x47   :  { %p829_p4 = scmp.ne.s32.totalorder %s1077_s7, %s828_s22  ;;  %p832_p5 = scmp.lt.u32.totalorder %s828_s22, %s1077_s7 }
  0x49   :  { %p834_p6 = pnand %p832_p5, %p829_p4 }
  0x4b   :  { %837 = shalt.err (!%p834_p6)
}
  0x4c   :  { %s838_s24 = scalar_lea.vmem %s74_s11, 2048  ;;  %p843_p8 = scmp.lt.s32.totalorder %s74_s11, %s74_s11 }
  0x4d   :  { %p839_p7 = scmp.ne.s32.totalorder %s74_s11, %s838_s24  ;;  %p844_p9 = scmp.lt.s32.totalorder %s838_s24, %s838_s24 }
  0x4f   :  { %p845_p10 = por %p844_p9, %p843_p8 }
  0x51   :  { %p846_p11 = pnand %p845_p10, %p839_p7 }
  0x53   :  { %849 = shalt.err (!%p846_p11)
}
  0x54   :  { %79 = dma.hbm_to_vmem [thread:$0]  %s1077_s7, 2048, %s74_s11, [#allocation8], %s881_s19, %s881_s19, %s882_s20  }
  0x55   :  { %s887_s29 = smov [#allocation10]   ;;  %s850_s3 = scalar_lea.hbm %s1078_s8, 16 }
  0x56   :  { %s86_s30 = sshll.u32 %s887_s29, 4  ;;  %p851_p12 = scmp.ne.s32.totalorder %s1078_s8, %s850_s3  ;;  %s87_s30 = int_to_ptr.vmem [resolvable:$true] %s86_s30 }
  0x57   :  { %p854_p13 = scmp.lt.u32.totalorder %s850_s3, %s1078_s8 }
  0x59   :  { %p856_p0 = pnand %p854_p13, %p851_p12 }
  0x5b   :  { %859 = shalt.err (!%p856_p0)
}
  0x5c   :  { %s860_s0 = scalar_lea.vmem %s87_s30, 16  ;;  %s864_s7 = scalar_lea.vmem %s87_s30, 32 }
  0x5d   :  { %p861_p1 = scmp.ne.s32.totalorder %s87_s30, %s860_s0  ;;  %p865_p2 = scmp.lt.s32.totalorder %s87_s30, %s87_s30 }
  0x5e   :  { %p866_p3 = scmp.lt.s32.totalorder %s864_s7, %s860_s0 }
  0x60   :  { %p867_p4 = por %p866_p3, %p865_p2 }
  0x62   :  { %p868_p5 = pnand %p867_p4, %p861_p1 }
  0x64   :  { %871 = shalt.err (!%p868_p5)
}
  0x65   :  { %89 = dma.hbm_to_vmem [thread:$0]  %s1078_s8, 16, %s87_s30, [#allocation11]  }
  0x66   :  { %872 = dma.done.wait [#allocation3], 128  }
  0x67   :  { %873 = vsyncadd [#allocation3], 4294967168 }
  0x68   :  { %874 = dma.done.wait [#allocation5], 4096  }
  0x69   :  { %875 = vsyncadd [#allocation5], 4294963200 }
  0x6a   :  { %876 = dma.done.wait [#allocation8], 2064  }
  0x6b   :  { %877 = vsyncadd [#allocation8], 4294965232 }
  0x6c   :  { %878 = dma.done.wait [#allocation11], 16  }
  0x6d   :  { %879 = vsyncadd [#allocation11], 4294967280  ;;  %v888_v0 = vmov 0.0|0.0   ;;  %vm889_vm0 = vmmov 0   ;;  %v890_v1 = vmov 0.0   ;;  %v109_v2 = vld [vmem:[%s1071_s1] sm:$0xff] }
  0x6e   :  { %654 = vmatprep.subr.bf16.mxu0 %v888_v0  ;;  %546 = vmatprep.mubr.msk.f32.mxu0 %vm889_vm0, %v890_v1  ;;  %v110_v3 = vld [vmem:[%s1071_s1 + $0x8] sm:$0xff]  ;;  %v193_v5 = vld [vmem:[#allocation4] sm:$0xff]  ;;  %v194_v6 = vld [vmem:[#allocation4 + $0x8] sm:$0xff]  ;;  %vm118_vm1 = vcmask 130048  }
  0x6f   :  { %657 = vmatprep.subr.bf16.mxu1 %v888_v0  ;;  %581 = vmatprep.mubr.msk.f32.mxu1 %vm889_vm0, %v890_v1  ;;  %v655_v4 = vpack.c.bf16 %v110_v3, %v109_v2  ;;  %v195_v7 = vld [vmem:[#allocation4 + $0x10] sm:$0xff]  ;;  %v658_v8 = vpack.c.bf16 %v194_v6, %v193_v5  ;;  %v196_v9 = vld [vmem:[#allocation4 + $0x18] sm:$0xff]  ;;  %v197_v12 = vld [vmem:[#allocation4 + $0x20] sm:$0xff] }
  0x70   :  { %v108_v10 = vld [vmem:[#allocation2] sm:$0xff]  ;;  %v661_v11 = vpack.c.bf16 %v196_v9, %v195_v7  ;;  %v198_v13 = vld [vmem:[#allocation4 + $0x28] sm:$0xff]  ;;  %v199_v15 = vld [vmem:[#allocation4 + $0x30] sm:$0xff] }
  0x71   :  { %656 = vmatpush3.bf16.msra.mxu0 %v655_v4  ;;  %659 = vmatpush3.bf16.msra.mxu1 %v658_v8  ;;  %v664_v14 = vpack.c.bf16 %v198_v13, %v197_v12  ;;  %v200_v16 = vld [vmem:[#allocation4 + $0x38] sm:$0xff]  ;;  %v201_v18 = vld [vmem:[#allocation4 + $0x40] sm:$0xff]  ;;  %v202_v19 = vld [vmem:[#allocation4 + $0x48] sm:$0xff] }
  0x72   :  { %681 = vmatprep.subr.bf16.mxu0 %v888_v0  ;;  %660 = vmatprep.subr.bf16.mxu1 %v888_v0  ;;  %v667_v17 = vpack.c.bf16 %v200_v16, %v199_v15  ;;  %v670_v20 = vpack.c.bf16 %v202_v19, %v201_v18  ;;  %v203_v21 = vld [vmem:[#allocation4 + $0x50] sm:$0xff]  ;;  %v204_v22 = vld [vmem:[#allocation4 + $0x58] sm:$0xff]  ;;  %v205_v24 = vld [vmem:[#allocation4 + $0x60] sm:$0xff] }
  0x73   :  { %v673_v23 = vpack.c.bf16 %v204_v22, %v203_v21  ;;  %v206_v25 = vld [vmem:[#allocation4 + $0x68] sm:$0xff]  ;;  %v207_v27 = vld [vmem:[#allocation4 + $0x70] sm:$0xff]  ;;  %v208_v28 = vld [vmem:[#allocation4 + $0x78] sm:$0xff] }
  0x74   :  { %547 = vmatmul.mubr.msk.f32.vlgmr.msra.gmra.mrb[0].mxu0 %vm118_vm1, %v108_v10  ;;  %v676_v26 = vpack.c.bf16 %v206_v25, %v205_v24  ;;  %v679_v29 = vpack.c.bf16 %v208_v28, %v207_v27  ;;  %v287_v30 = vld [vmem:[#allocation6] sm:$0xff]  ;;  %v288_v31 = vld [vmem:[#allocation6 + $0x8] sm:$0xff]  ;;  %v289_v32 = vld [vmem:[#allocation6 + $0x10] sm:$0xff] }
  0x75   :  { %616 = vmatprep.mubr.msk.f32.mxu0 %vm889_vm0, %v890_v1  ;;  %662 = vmatpush3.bf16.msra.mxu1 %v661_v11  ;;  %v682_v33 = vpack.c.bf16 %v288_v31, %v287_v30  ;;  %v290_v34 = vld [vmem:[#allocation6 + $0x18] sm:$0xff]  ;;  %v291_v36 = vld [vmem:[#allocation6 + $0x20] sm:$0xff]  ;;  %v292_v37 = vld [vmem:[#allocation6 + $0x28] sm:$0xff] }
  0x76   :  { %663 = vmatprep.subr.bf16.mxu1 %v888_v0  ;;  %v685_v35 = vpack.c.bf16 %v290_v34, %v289_v32  ;;  %v688_v38 = vpack.c.bf16 %v292_v37, %v291_v36  ;;  %v293_v39 = vld [vmem:[#allocation6 + $0x30] sm:$0xff]  ;;  %v294_v40 = vld [vmem:[#allocation6 + $0x38] sm:$0xff]  ;;  %v295_v42 = vld [vmem:[#allocation6 + $0x40] sm:$0xff] }
  0x77   :  { %683 = vmatpush3.bf16.msra.mxu0 %v682_v33  ;;  %v691_v41 = vpack.c.bf16 %v294_v40, %v293_v39  ;;  %v296_v43 = vld [vmem:[#allocation6 + $0x48] sm:$0xff]  ;;  %v297_v45 = vld [vmem:[#allocation6 + $0x50] sm:$0xff]  ;;  %v298_v46 = vld [vmem:[#allocation6 + $0x58] sm:$0xff] }
  0x78   :  { %684 = vmatprep.subr.bf16.mxu0 %v888_v0  ;;  %v694_v44 = vpack.c.bf16 %v296_v43, %v295_v42  ;;  %v697_v47 = vpack.c.bf16 %v298_v46, %v297_v45  ;;  %v299_v48 = vld [vmem:[#allocation6 + $0x60] sm:$0xff]  ;;  %v300_v49 = vld [vmem:[#allocation6 + $0x68] sm:$0xff]  ;;  %v301_v56 = vld [vmem:[#allocation6 + $0x70] sm:$0xff] }
  0x79   :  { %665 = vmatpush3.bf16.msra.mxu1 %v664_v14  ;;  %v700_v50 = vpack.c.bf16 %v300_v49, %v299_v48  ;;  %v483_v51 = vld [vmem:[%s1072_s2] ss:$0 sm:$0xff]  ;;  %v302_v57 = vld [vmem:[#allocation6 + $0x78] sm:$0xff]  ;;  %v382_v60 = vld [vmem:[#allocation9 + $0x8] sm:$0xff] }
  0x7a   :  { %666 = vmatprep.subr.bf16.mxu1 %v888_v0  ;;  %v703_v58 = vpack.c.bf16 %v302_v57, %v301_v56  ;;  %v381_v59 = vld [vmem:[#allocation9] sm:$0xff]  ;;  %v383_v61 = vld [vmem:[#allocation9 + $0x10] sm:$0xff]  ;;  %v384_v63 = vld [vmem:[#allocation9 + $0x18] sm:$0xff] }
  0x7b   :  { %686 = vmatpush3.bf16.msra.mxu0 %v685_v35  ;;  %v706_v62 = vpack.c.bf16 %v382_v60, %v381_v59  ;;  %v709_v2 = vpack.c.bf16 %v384_v63, %v383_v61  ;;  %v385_v3 = vld [vmem:[#allocation9 + $0x20] sm:$0xff]  ;;  %v386_v4 = vld [vmem:[#allocation9 + $0x28] sm:$0xff]  ;;  %v388_v6 = vld [vmem:[#allocation9 + $0x38] sm:$0xff] }
  0x7c   :  { %687 = vmatprep.subr.bf16.mxu0 %v888_v0  ;;  %v712_v5 = vpack.c.bf16 %v386_v4, %v385_v3  ;;  %v389_v8 = vld [vmem:[#allocation9 + $0x40] sm:$0xff]  ;;  %v390_v9 = vld [vmem:[#allocation9 + $0x48] sm:$0xff]  ;;  %v391_v11 = vld [vmem:[#allocation9 + $0x50] sm:$0xff] }
  0x7d   :  { %668 = vmatpush3.bf16.msra.mxu1 %v667_v17  ;;  %v718_v10 = vpack.c.bf16 %v390_v9, %v389_v8  ;;  %v392_v12 = vld [vmem:[#allocation9 + $0x58] sm:$0xff]  ;;  %v393_v14 = vld [vmem:[#allocation9 + $0x60] sm:$0xff]  ;;  %v394_v15 = vld [vmem:[#allocation9 + $0x68] sm:$0xff] }
  0x7e   :  { %669 = vmatprep.subr.bf16.mxu1 %v888_v0  ;;  %v721_v13 = vpack.c.bf16 %v392_v12, %v391_v11  ;;  %v724_v16 = vpack.c.bf16 %v394_v15, %v393_v14  ;;  %v485_v17 = vld [vmem:[%s1074_s4] ss:$0 sm:$0xff]  ;;  %v395_v22 = vld [vmem:[#allocation9 + $0x70] sm:$0xff]  ;;  %v486_v25 = vld [vmem:[#allocation7] ss:$0 sm:$0xff] }
  0x7f   :  { %689 = vmatpush3.bf16.msra.mxu0 %v688_v38 }
  0x80   :  { %690 = vmatprep.subr.bf16.mxu0 %v888_v0 }
  0x81   :  { %671 = vmatpush3.bf16.msra.mxu1 %v670_v20 }
  0x82   :  { %672 = vmatprep.subr.bf16.mxu1 %v888_v0 }
  0x83   :  { %692 = vmatpush3.bf16.msra.mxu0 %v691_v41 }
  0x84   :  { %693 = vmatprep.subr.bf16.mxu0 %v888_v0 }
  0x85   :  { %674 = vmatpush3.bf16.msra.mxu1 %v673_v23  ;;  %v396_v23 = vld [vmem:[#allocation9 + $0x78] sm:$0xff] }
  0x86   :  { %675 = vmatprep.subr.bf16.mxu1 %v888_v0  ;;  %v727_v24 = vpack.c.bf16 %v396_v23, %v395_v22 }
  0x87   :  { %695 = vmatpush3.bf16.msra.mxu0 %v694_v44 }
  0x88   :  { %696 = vmatprep.subr.bf16.mxu0 %v888_v0 }
  0x89   :  { %677 = vmatpush3.bf16.msra.mxu1 %v676_v26 }
  0x8a   :  { %678 = vmatprep.subr.bf16.mxu1 %v888_v0 }
  0x8b   :  { %698 = vmatpush3.bf16.msra.mxu0 %v697_v47 }
  0x8c   :  { %699 = vmatprep.subr.bf16.mxu0 %v888_v0 }
  0x8d   :  { %680 = vmatpush3.bf16.msra.mxu1 %v679_v29 }
  0x8e   :  { %705 = vmatprep.subr.bf16.mxu1 %v888_v0 }
  0x8f   :  { %701 = vmatpush3.bf16.msra.mxu0 %v700_v50 }
  0x90   :  { %702 = vmatprep.subr.bf16.mxu0 %v888_v0 }
  0x93   :  { %704 = vmatpush3.bf16.msra.mxu0 %v703_v58 }
 0x147   :  { %v188_v52 = vpop.f32.mrb[0].mxu0 }
 0x148   :  { %v189_v53 = vadd.f32 %v483_v51, %v188_v52  ;;  %v548_v54 = vpop.f32.mrb[1].mxu0 }
 0x14a   :  { %v192_v55 = vmax.f32 %v189_v53, 0.0 }
 0x14c   :  { %582 = vmatmul.mubr.f32.vlgmr.msra.gmra.mrb[0].mxu1 %v192_v55 }
 0x14d   :  { %651 = vmatprep.mubr.msk.f32.mxu1 %vm889_vm0, %v890_v1  ;;  %707 = vmatpush3.bf16.msra.mxu1 %v706_v62  ;;  %v387_v1 = vld [vmem:[#allocation9 + $0x30] sm:$0xff] }
 0x14e   :  { %708 = vmatprep.subr.bf16.mxu1 %v888_v0  ;;  %v715_v7 = vpack.c.bf16 %v388_v6, %v387_v1 }
 0x151   :  { %710 = vmatpush3.bf16.msra.mxu1 %v709_v2 }
 0x152   :  { %711 = vmatprep.subr.bf16.mxu1 %v888_v0 }
 0x155   :  { %713 = vmatpush3.bf16.msra.mxu1 %v712_v5 }
 0x156   :  { %714 = vmatprep.subr.bf16.mxu1 %v888_v0 }
 0x159   :  { %716 = vmatpush3.bf16.msra.mxu1 %v715_v7 }
 0x15a   :  { %717 = vmatprep.subr.bf16.mxu1 %v888_v0 }
 0x15d   :  { %719 = vmatpush3.bf16.msra.mxu1 %v718_v10 }
 0x15e   :  { %720 = vmatprep.subr.bf16.mxu1 %v888_v0 }
 0x161   :  { %722 = vmatpush3.bf16.msra.mxu1 %v721_v13 }
 0x162   :  { %723 = vmatprep.subr.bf16.mxu1 %v888_v0 }
 0x165   :  { %725 = vmatpush3.bf16.msra.mxu1 %v724_v16 }
 0x166   :  { %726 = vmatprep.subr.bf16.mxu1 %v888_v0  ;;  %v487_v0 = vld [vmem:[#allocation10] ss:$0 sm:$0xff] }
 0x169   :  { %728 = vmatpush3.bf16.msra.mxu1 %v727_v24 }
 0x21f   :  { %v282_v18 = vpop.f32.mrb[0].mxu1 }
 0x220   :  { %v283_v19 = vadd.f32 %v485_v17, %v282_v18  ;;  %v583_v20 = vpop.f32.mrb[1].mxu1 }
 0x222   :  { %v286_v21 = vmax.f32 %v283_v19, 0.0 }
 0x224   :  { %617 = vmatmul.mubr.f32.vlgmr.msra.gmra.mrb[2].mxu0 %v286_v21 }
 0x2f7   :  { %v376_v26 = vpop.f32.mrb[2].mxu0 }
 0x2f8   :  { %v377_v27 = vadd.f32 %v486_v25, %v376_v26  ;;  %v618_v28 = vpop.f32.mrb[3].mxu0 }
 0x2fa   :  { %v380_v29 = vmax.f32 %v377_v27, 0.0 }
 0x2fc   :  { %652 = vmatmul.mubr.f32.vlgmr.msra.gmra.mrb[2].mxu1 %v380_v29 }
 0x3cf   :  { %v470_v30 = vpop.f32.mrb[2].mxu1 }
 0x3d0   :  { %v471_v31 = vadd.f32 %v487_v0, %v470_v30  ;;  %v653_v32 = vpop.f32.mrb[3].mxu1 }
 0x3d2   :  { %474 = vst [vmem:[%s1079_s9] sm:$0xff] %v471_v31 }
 0x3d3   :  { %479 = vsyncpa [#allocation3], 1 }
 0x3d4   :  { %480 = vsyncpa [#allocation5], 1 }
 0x3d5   :  { %481 = vsyncpa [#allocation8], 1 }
 0x3d6   :  { %482 = vsyncpa [#allocation11], 1 }

</bundles_post_ra>
